<compile_context>
chip_gen: v5e
topology: v5e:2x2
jax: 0.10.0
libtpu: 0.0.40
codegen_flags: <defaults>
</compile_context>

<pallas_src>
import jax
import jax.numpy as jnp
from jax.experimental import pallas as pl
from jax.experimental.pallas import tpu as pltpu


_LANE = 128                         # lane width / minor-dim alignment
_MAX_TILE = 512                     # 512x512 f32 = 1 MiB/tile -> ~4 MiB with
                                    # in+out double buffering
_MAX_BLOCK_BYTES = 2 * 1024 * 1024  # per-buffer budget for the batched path
                                    # (x4 with in/out double buffering = 8 MiB)


def _swap_minor_kernel(x_ref, o_ref):
    # x_ref: (N, TH, TW) VMEM tile  ->  o_ref: (N, TW, TH) VMEM tile.
    # Batched XLU sublane<->lane transpose of the two minor axes.
    o_ref[...] = jnp.swapaxes(x_ref[...], 1, 2)


def _transpose_minor(x3: jax.Array) -> jax.Array:
    """(BC, H, W) -> (BC, W, H) via a single tiled Pallas call."""
    BC, H, W = x3.shape
    itemsize = x3.dtype.itemsize

    # Per-axis tile: lane-dense multiple of 128 when the axis is big enough,
    # otherwise the full axis (full-extent block dims are always legal).
    th = min(_MAX_TILE, (H // _LANE) * _LANE) if H >= _LANE else H
    tw = min(_MAX_TILE, (W // _LANE) * _LANE) if W >= _LANE else W

    # If a single tile already spans the whole image, batch several images per
    # block to amortize per-grid-step overhead (stay within the VMEM budget).
    nblk = 1
    if th == H and tw == W:
        image_bytes = max(H * W * itemsize, 1)
        nblk = max(1, min(BC, _MAX_BLOCK_BYTES // image_bytes))

    grid = (pl.cdiv(BC, nblk), pl.cdiv(H, th), pl.cdiv(W, tw))

    return pl.pallas_call(
        _swap_minor_kernel,
        out_shape=jax.ShapeDtypeStruct((BC, W, H), x3.dtype),
        grid_spec=pltpu.PrefetchScalarGridSpec(
            num_scalar_prefetch=0,
            grid=grid,
            in_specs=[pl.BlockSpec((nblk, th, tw), lambda n, i, j: (n, i, j))],
            out_specs=pl.BlockSpec((nblk, tw, th), lambda n, i, j: (n, j, i)),
        ),
        compiler_params=pltpu.CompilerParams(
            # Independent tiles only -> shard across both v7x TensorCores.
            dimension_semantics=("parallel", "parallel", "parallel"),
        ),
    )(x3)


def pallas_transpose(x: jax.Array, dims=(2, 3)) -> jax.Array:
    """Equivalent of torch.Tensor.transpose(*dims)."""
    nd = x.ndim
    d0, d1 = (d % nd for d in dims)
    if d0 == d1:
        return x
    lo, hi = sorted((d0, d1))
    if (lo, hi) != (nd - 2, nd - 1):
        # Swapping non-minor axes is pure index routing (no lane/sublane data
        # movement); a Pallas kernel adds nothing over XLA's relayout here.
        # TODO(synk): add a Pallas routing path for non-minor swaps if a fused consumer needs it.
        return jnp.swapaxes(x, d0, d1)

    *lead, H, W = x.shape
    BC = 1
    for s in lead:
        BC *= s
    if BC == 0 or H == 0 or W == 0:
        return jnp.swapaxes(x, d0, d1)

    x3 = x.reshape(BC, H, W)                     # free reshape (row-major)
    out3 = _transpose_minor(x3)
    return out3.reshape(*lead, W, H)             # free reshape (row-major)


class TransposePallas:
    """Mirror of the PyTorch module: holds the axis pair, forwards via Pallas."""

    def __init__(self, shape: tuple):
        self.shape = shape

    def __call__(self, x: jax.Array) -> jax.Array:
        return pallas_transpose(x, self.shape)


if __name__ == "__main__":
    keys = jax.random.split(jax.random.PRNGKey(0), 4)
    module = TransposePallas(shape=(2, 3))

    # 1) Small NCHW input consistent with the module (batch=2, channels=4,
    #    small spatial) -> batched small-image path (all 8 images in 1 block).
    x_small = jax.random.normal(keys[0], (2, 4, 16, 32), dtype=jnp.float32)
    out_small = jax.block_until_ready(module(x_small))
    ref_small = jnp.swapaxes(x_small, 2, 3)
    assert out_small.shape == ref_small.shape and out_small.dtype == ref_small.dtype
    assert jnp.array_equal(out_small, ref_small), "mismatch (batched path)"

    # 2) Lane-dense tiled path (both spatial dims multiples of 128).
    x_big = jax.random.normal(keys[1], (1, 2, 256, 384), dtype=jnp.float32)
    out_big = jax.block_until_ready(module(x_big))
    assert jnp.array_equal(out_big, jnp.swapaxes(x_big, 2, 3)), "mismatch (tiled path)"

    # 3) Non-divisible spatial dims -> exercises masked edge tiles.
    x_ragged = jax.random.normal(keys[2], (2, 3, 200, 160), dtype=jnp.float32)
    out_ragged = jax.block_until_ready(module(x_ragged))
    assert jnp.array_equal(out_ragged, jnp.swapaxes(x_ragged, 2, 3)), "mismatch (ragged)"

    # 4) Mixed case: one big axis, one tiny axis.
    x_mixed = jax.random.normal(keys[3], (2, 2, 256, 64), dtype=jnp.float32)
    out_mixed = jax.block_until_ready(module(x_mixed))
    assert jnp.array_equal(out_mixed, jnp.swapaxes(x_mixed, 2, 3)), "mismatch (mixed)"

    print("KERNEL_OK")
</pallas_src>

<mosaic_0001>
module attributes {stable_mosaic.version = 11 : i64} {
  func.func @_swap_minor_kernel(%arg0: i32, %arg1: i32, %arg2: i32, %arg3: memref<8x16x32xf32, #tpu.memory_space<vmem>>, %arg4: memref<8x32x16xf32, #tpu.memory_space<vmem>>) attributes {dimension_semantics = [#tpu.dimension_semantics<parallel>, #tpu.dimension_semantics<parallel>, #tpu.dimension_semantics<parallel>], iteration_bounds = array<i64: 1, 1, 1>, scalar_prefetch = 0 : i64, scratch_operands = 0 : i64, tpu.core_type = #tpu.core_type<tc>, window_params = [{transform_indices = @transform_0, window_bounds = array<i64: 8, 16, 32>}, {transform_indices = @transform_1, window_bounds = array<i64: 8, 32, 16>}]} {
    %c0 = arith.constant 0 : index
    %c0_0 = arith.constant 0 : index
    %c0_1 = arith.constant 0 : index
    %0 = vector.load %arg3[%c0, %c0_0, %c0_1] : memref<8x16x32xf32, #tpu.memory_space<vmem>>, vector<8x16x32xf32>
    %1 = tpu.transpose %0, [0, 2, 1] : vector<8x16x32xf32> -> vector<8x32x16xf32>
    %c0_2 = arith.constant 0 : index
    %c0_3 = arith.constant 0 : index
    %c0_4 = arith.constant 0 : index
    %2 = vector.load %arg4[%c0_2, %c0_3, %c0_4] : memref<8x32x16xf32, #tpu.memory_space<vmem>>, vector<8x32x16xf32>
    tpu.vector_store %arg4[%c0_2, %c0_3, %c0_4], %1 {strides = array<i32>} : memref<8x32x16xf32, #tpu.memory_space<vmem>>, vector<8x32x16xf32>,
    return
  }
  func.func @transform_0(%arg0: i32, %arg1: i32, %arg2: i32) -> (i32, i32, i32) {
    %c0_i32 = arith.constant 0 : i32
    return %arg0, %arg1, %arg2 : i32, i32, i32
  }
  func.func @transform_1(%arg0: i32, %arg1: i32, %arg2: i32) -> (i32, i32, i32) {
    %c0_i32 = arith.constant 0 : i32
    return %arg0, %arg2, %arg1 : i32, i32, i32
  }
}

</mosaic_0001>

<bundles_post_ra>
// kernel: tpu_custom_call.1
= control target key start
LH: loop header
LB: loop body
LE: loop exit
PB: predicated region body
PF: predicated region fallthrough
CT: control target
= control target key end

     0   :  { %6 = vsyncpa [#allocation3], 0  ;;  %s364_s9 = smov [#allocation2]   ;;  %s365_s11 = smov 128   ;;  %s508_s0 = inlined_call_operand.hbm [shape: f32[8,16,32], index: 0, kind: input, shape index: {}]   ;;  %s509_s1 = inlined_call_operand.vmem [shape: f32[8,32,16], index: 1, kind: output, shape index: {}]  }
   0x1   :  { %s11_s8 = sshll.u32 %s508_s0, 4  ;;  %s13_s10 = sshll.u32 %s364_s9, 4  ;;  %s12_s8 = int_to_ptr.hbm [resolvable:$true] %s11_s8  ;;  %s14_s10 = int_to_ptr.vmem [resolvable:$true] %s13_s10 }
   0x2   :  { %s366_s12 = smov 8  }
   0x3   :  { %19 = dma.hbm_to_vmem [thread:$0]  %s12_s8, 2048, %s14_s10, [#allocation3], %s365_s11, %s365_s11, %s366_s12  }
   0x4   :  { %362 = dma.done.wait [#allocation3], 2048  }
   0x5   :  { %363 = vsyncadd [#allocation3], 4294965248  ;;  %v26_v0 = vld [vmem:[#allocation2 + $0x10] sm:$0xff]  ;;  %v24_v1 = vld [vmem:[#allocation2] sm:$0xff]  ;;  %vm296_vm0 = vcmask 130048  }
   0x6   :  { %72 = vxpose.xlu1.b32.start [1/2] (short) (narrow) %v26_v0, 32  ;;  %40 = vxpose.xlu0.b32.start [1/2] (short) (narrow) %v24_v1, 32  ;;  %v27_v2 = vld [vmem:[#allocation2 + $0x18] sm:$0xff]  ;;  %v25_v3 = vld [vmem:[#allocation2 + $0x8] sm:$0xff]  ;;  %v28_v4 = vld [vmem:[#allocation2 + $0x20] sm:$0xff] }
   0x7   :  { %104 = vxpose.xlu2.b32.start [1/2] (short) (narrow) %v28_v4, 32  ;;  %v29_v5 = vld [vmem:[#allocation2 + $0x28] sm:$0xff]  ;;  %v32_v6 = vld [vmem:[#allocation2 + $0x40] sm:$0xff]  ;;  %v30_v7 = vld [vmem:[#allocation2 + $0x30] sm:$0xff] }
   0x8   :  { %v33_v8 = vld [vmem:[#allocation2 + $0x48] sm:$0xff]  ;;  %v31_v9 = vld [vmem:[#allocation2 + $0x38] sm:$0xff]  ;;  %v34_v10 = vld [vmem:[#allocation2 + $0x50] sm:$0xff] }
   0x9   :  { %v35_v11 = vld [vmem:[#allocation2 + $0x58] sm:$0xff]  ;;  %v38_v12 = vld [vmem:[#allocation2 + $0x70] sm:$0xff]  ;;  %v36_v13 = vld [vmem:[#allocation2 + $0x60] sm:$0xff] }
   0xa   :  { %v39_v14 = vld [vmem:[#allocation2 + $0x78] sm:$0xff]  ;;  %v37_v15 = vld [vmem:[#allocation2 + $0x68] sm:$0xff] }
   0xe   :  { %73 = vxpose.xlu1.b32.end [2/2] (short) (narrow) %v27_v2, 32  ;;  %41 = vxpose.xlu0.b32.end [2/2] (short) (narrow) %v25_v3, 32 }
   0xf   :  { %105 = vxpose.xlu2.b32.end [2/2] (short) (narrow) %v29_v5, 32 }
  0x26   :  { %168 = vxpose.xlu1.b32.start [1/2] (short) (narrow) %v32_v6, 32  ;;  %136 = vxpose.xlu0.b32.start [1/2] (short) (narrow) %v30_v7, 32 }
  0x27   :  { %200 = vxpose.xlu2.b32.start [1/2] (short) (narrow) %v34_v10, 32 }
  0x2e   :  { %169 = vxpose.xlu1.b32.end [2/2] (short) (narrow) %v33_v8, 32  ;;  %137 = vxpose.xlu0.b32.end [2/2] (short) (narrow) %v31_v9, 32 }
  0x2f   :  { %201 = vxpose.xlu2.b32.end [2/2] (short) (narrow) %v35_v11, 32 }
  0x46   :  { %264 = vxpose.xlu1.b32.start [1/2] (short) (narrow) %v38_v12, 32  ;;  %232 = vxpose.xlu0.b32.start [1/2] (short) (narrow) %v36_v13, 32 }
  0x4e   :  { %265 = vxpose.xlu1.b32.end [2/2] (short) (narrow) %v39_v14, 32  ;;  %233 = vxpose.xlu0.b32.end [2/2] (short) (narrow) %v37_v15, 32 }
  0xa0   :  { %v120_v16 = vpop.trf.xlu2 }
  0xa1   :  { %305 = vst.msk [vmem:[%s509_s1 + $0x40] sm:$0xff] %vm296_vm0, %v120_v16 }
  0xa8   :  { %v121_v19 = vpop.trf.xlu2 }
  0xa9   :  { %306 = vst.msk [vmem:[%s509_s1 + $0x48] sm:$0xff] %vm296_vm0, %v121_v19 }
  0xaa   :  { %v88_v17 = vpop.trf.xlu1  ;;  %v56_v18 = vpop.trf.xlu0 }
  0xab   :  { %301 = vst.msk [vmem:[%s509_s1 + $0x20] sm:$0xff] %vm296_vm0, %v88_v17 }
  0xac   :  { %297 = vst.msk [vmem:[%s509_s1] sm:$0xff] %vm296_vm0, %v56_v18 }
  0xb0   :  { %v122_v22 = vpop.trf.xlu2 }
  0xb1   :  { %307 = vst.msk [vmem:[%s509_s1 + $0x50] sm:$0xff] %vm296_vm0, %v122_v22 }
  0xb2   :  { %v89_v20 = vpop.trf.xlu1  ;;  %v57_v21 = vpop.trf.xlu0 }
  0xb3   :  { %302 = vst.msk [vmem:[%s509_s1 + $0x28] sm:$0xff] %vm296_vm0, %v89_v20 }
  0xb4   :  { %298 = vst.msk [vmem:[%s509_s1 + $0x8] sm:$0xff] %vm296_vm0, %v57_v21 }
  0xb8   :  { %v123_v25 = vpop.trf.xlu2 }
  0xb9   :  { %308 = vst.msk [vmem:[%s509_s1 + $0x58] sm:$0xff] %vm296_vm0, %v123_v25 }
  0xba   :  { %v90_v23 = vpop.trf.xlu1  ;;  %v58_v24 = vpop.trf.xlu0 }
  0xbb   :  { %303 = vst.msk [vmem:[%s509_s1 + $0x30] sm:$0xff] %vm296_vm0, %v90_v23 }
  0xbc   :  { %299 = vst.msk [vmem:[%s509_s1 + $0x10] sm:$0xff] %vm296_vm0, %v58_v24 }
  0xc0   :  { %v216_v28 = vpop.trf.xlu2 }
  0xc1   :  { %317 = vst.msk [vmem:[%s509_s1 + $0xa0] sm:$0xff] %vm296_vm0, %v216_v28 }
  0xc2   :  { %v91_v26 = vpop.trf.xlu1  ;;  %v59_v27 = vpop.trf.xlu0 }
  0xc3   :  { %304 = vst.msk [vmem:[%s509_s1 + $0x38] sm:$0xff] %vm296_vm0, %v91_v26 }
  0xc4   :  { %300 = vst.msk [vmem:[%s509_s1 + $0x18] sm:$0xff] %vm296_vm0, %v59_v27 }
  0xc8   :  { %v217_v31 = vpop.trf.xlu2 }
  0xc9   :  { %318 = vst.msk [vmem:[%s509_s1 + $0xa8] sm:$0xff] %vm296_vm0, %v217_v31 }
  0xca   :  { %v184_v29 = vpop.trf.xlu1  ;;  %v152_v30 = vpop.trf.xlu0 }
  0xcb   :  { %313 = vst.msk [vmem:[%s509_s1 + $0x80] sm:$0xff] %vm296_vm0, %v184_v29 }
  0xcc   :  { %309 = vst.msk [vmem:[%s509_s1 + $0x60] sm:$0xff] %vm296_vm0, %v152_v30 }
  0xd0   :  { %v218_v34 = vpop.trf.xlu2 }
  0xd1   :  { %319 = vst.msk [vmem:[%s509_s1 + $0xb0] sm:$0xff] %vm296_vm0, %v218_v34 }
  0xd2   :  { %v185_v32 = vpop.trf.xlu1  ;;  %v153_v33 = vpop.trf.xlu0 }
  0xd3   :  { %314 = vst.msk [vmem:[%s509_s1 + $0x88] sm:$0xff] %vm296_vm0, %v185_v32 }
  0xd4   :  { %310 = vst.msk [vmem:[%s509_s1 + $0x68] sm:$0xff] %vm296_vm0, %v153_v33 }
  0xd8   :  { %v219_v37 = vpop.trf.xlu2 }
  0xd9   :  { %320 = vst.msk [vmem:[%s509_s1 + $0xb8] sm:$0xff] %vm296_vm0, %v219_v37 }
  0xda   :  { %v186_v35 = vpop.trf.xlu1  ;;  %v154_v36 = vpop.trf.xlu0 }
  0xdb   :  { %315 = vst.msk [vmem:[%s509_s1 + $0x90] sm:$0xff] %vm296_vm0, %v186_v35 }
  0xdc   :  { %311 = vst.msk [vmem:[%s509_s1 + $0x70] sm:$0xff] %vm296_vm0, %v154_v36 }
  0xe2   :  { %v187_v38 = vpop.trf.xlu1  ;;  %v155_v39 = vpop.trf.xlu0 }
  0xe3   :  { %316 = vst.msk [vmem:[%s509_s1 + $0x98] sm:$0xff] %vm296_vm0, %v187_v38 }
  0xe4   :  { %312 = vst.msk [vmem:[%s509_s1 + $0x78] sm:$0xff] %vm296_vm0, %v155_v39 }
  0xea   :  { %v280_v40 = vpop.trf.xlu1  ;;  %v248_v41 = vpop.trf.xlu0 }
  0xeb   :  { %325 = vst.msk [vmem:[%s509_s1 + $0xe0] sm:$0xff] %vm296_vm0, %v280_v40 }
  0xec   :  { %321 = vst.msk [vmem:[%s509_s1 + $0xc0] sm:$0xff] %vm296_vm0, %v248_v41 }
  0xf2   :  { %v281_v42 = vpop.trf.xlu1  ;;  %v249_v43 = vpop.trf.xlu0 }
  0xf3   :  { %326 = vst.msk [vmem:[%s509_s1 + $0xe8] sm:$0xff] %vm296_vm0, %v281_v42 }
  0xf4   :  { %322 = vst.msk [vmem:[%s509_s1 + $0xc8] sm:$0xff] %vm296_vm0, %v249_v43 }
  0xfa   :  { %v282_v44 = vpop.trf.xlu1  ;;  %v250_v45 = vpop.trf.xlu0 }
  0xfb   :  { %327 = vst.msk [vmem:[%s509_s1 + $0xf0] sm:$0xff] %vm296_vm0, %v282_v44 }
  0xfc   :  { %323 = vst.msk [vmem:[%s509_s1 + $0xd0] sm:$0xff] %vm296_vm0, %v250_v45 }
 0x102   :  { %v283_v46 = vpop.trf.xlu1  ;;  %v251_v47 = vpop.trf.xlu0 }
 0x103   :  { %328 = vst.msk [vmem:[%s509_s1 + $0xf8] sm:$0xff] %vm296_vm0, %v283_v46 }
 0x104   :  { %324 = vst.msk [vmem:[%s509_s1 + $0xd8] sm:$0xff] %vm296_vm0, %v251_v47 }
 0x105   :  { %333 = vsyncpa [#allocation3], 1 }

</bundles_post_ra>
